<compile_context>
chip_gen: v6e
topology: v6e:2x2x1
jax: 0.10.0
libtpu: 0.0.40
codegen_flags: <defaults>
</compile_context>

<pallas_src>
import functools

import numpy as np
import jax
import jax.numpy as jnp
from jax.experimental import pallas as pl
from jax.experimental.pallas import tpu as pltpu


# ---------------------------------------------------------------------------
# Single fused Pallas kernel: 5 GCN layers + merged heads
# ---------------------------------------------------------------------------
def _fused_net_kernel(a_t2s_ref, a_s2t_ref, x_ref,
                      w1_ref, b1_ref, w2_ref, b2_ref,
                      wp_ref, bp_ref, w3_ref, b3_ref,
                      wpr_ref, bpr_ref, wh_ref, bh_ref,
                      probs_ref, head_ref):
    f32 = jnp.float32
    a_t2s = a_t2s_ref[...]
    a_s2t = a_s2t_ref[...]

    # conv_succ1 (target_to_source), Fin=32 -> Fout=128.
    # Fin < Fout: do (A @ X) @ W so the N x N matmul runs on the narrow (N,32)
    # operand and the intermediate stays (N,32).
    h = jnp.dot(a_t2s, x_ref[...], preferred_element_type=f32)
    h = jnp.dot(h, w1_ref[...], preferred_element_type=f32) + b1_ref[...]
    h = jnp.maximum(h, 0.0)

    # conv_succ2 (target_to_source), 128 -> 128
    h = jnp.dot(h, w2_ref[...], preferred_element_type=f32)
    h = jnp.dot(a_t2s, h, preferred_element_type=f32) + b2_ref[...]
    h = jnp.maximum(h, 0.0)

    # conv_pred1 (default flow: source_to_target), 128 -> 128
    h = jnp.dot(h, wp_ref[...], preferred_element_type=f32)
    h = jnp.dot(a_s2t, h, preferred_element_type=f32) + bp_ref[...]
    h = jnp.maximum(h, 0.0)

    # conv_succ3 (target_to_source), 128 -> 128
    h = jnp.dot(h, w3_ref[...], preferred_element_type=f32)
    h = jnp.dot(a_t2s, h, preferred_element_type=f32) + b3_ref[...]
    h = jnp.maximum(h, 0.0)

    # conv_probs (target_to_source), 128 -> 1.  X @ W first keeps the
    # intermediate at (N, 1).
    p = jnp.dot(h, wpr_ref[...], preferred_element_type=f32)
    probs_ref[...] = jnp.dot(a_t2s, p, preferred_element_type=f32) + bpr_ref[...]

    # Heads: mean over nodes, single merged (128, 2) matmul.
    # column 0 = value, column 1 = do_nothing.
    x_mean = jnp.mean(h, axis=0, keepdims=True)
    head_ref[...] = (
        jnp.dot(x_mean, wh_ref[...], preferred_element_type=f32) + bh_ref[...]
    )


def fused_net_pallas(a_t2s, a_s2t, x, params):
    """One pallas_call computing (probs (N,1), head (1,2)=[value, do_nothing])."""
    n = x.shape[0]
    vmem = pl.BlockSpec(memory_space=pltpu.MemorySpace.VMEM)

    # Merge the two (128,1) head weights into one (128,2) matmul.
    w_head = jnp.concatenate([params["w_value"], params["w_nothing"]], axis=1)
    b_head = jnp.concatenate(
        [params["b_value"], params["b_nothing"]], axis=0
    ).reshape(1, 2)

    args = (
        a_t2s, a_s2t, x,
        params["w_succ1"], params["b_succ1"].reshape(1, -1),
        params["w_succ2"], params["b_succ2"].reshape(1, -1),
        params["w_pred1"], params["b_pred1"].reshape(1, -1),
        params["w_succ3"], params["b_succ3"].reshape(1, -1),
        params["w_probs"], params["b_probs"].reshape(1, -1),
        w_head, b_head,
    )

    probs, head = pl.pallas_call(
        _fused_net_kernel,
        out_shape=(
            jax.ShapeDtypeStruct((n, 1), jnp.float32),
            jax.ShapeDtypeStruct((1, 2), jnp.float32),
        ),
        in_specs=[vmem] * len(args),
        out_specs=(vmem, vmem),
    )(*args)
    return probs, head


# ---------------------------------------------------------------------------
# Host glue: dense GCN-normalized adjacency (built ONCE per graph, reused)
# ---------------------------------------------------------------------------
def gcn_norm_dense(edge_index, num_nodes, flow):
    """Dense normalized adjacency equivalent to PyG GCNConv propagation.

    flow='source_to_target': out[dst] += w_e * h[src], degree at dst.
    flow='target_to_source': out[src] += w_e * h[dst], degree at src.
    Self loops added; w_e = deg^{-1/2}[src] * deg^{-1/2}[dst].
    """
    src = np.asarray(edge_index[0], np.int64)
    dst = np.asarray(edge_index[1], np.int64)
    loop = np.arange(num_nodes, dtype=np.int64)
    src = np.concatenate([src, loop])
    dst = np.concatenate([dst, loop])

    agg_idx = dst if flow == "source_to_target" else src
    deg = np.zeros(num_nodes, np.float64)
    np.add.at(deg, agg_idx, 1.0)
    with np.errstate(divide="ignore"):
        dis = deg ** -0.5
    dis[np.isinf(dis)] = 0.0
    w = dis[src] * dis[dst]

    a = np.zeros((num_nodes, num_nodes), np.float32)
    if flow == "source_to_target":
        np.add.at(a, (dst, src), w)  # row = aggregating node, col = message src
    else:
        np.add.at(a, (src, dst), w)
    return jnp.asarray(a)


# ---------------------------------------------------------------------------
# Full Net forward (device portion jitted; adjacencies passed in, cached)
# ---------------------------------------------------------------------------
@jax.jit
def _net_forward_device(params, x, a_t2s, a_s2t, ready_idx):
    probs, head = fused_net_pallas(a_t2s, a_s2t, x, params)
    v = head[:, 0]             # (1,)
    prob_nothing = head[:, 1]  # (1,)
    probs_ready = jnp.take(probs[:, 0], ready_idx, axis=0)
    logits = jnp.concatenate([probs_ready, prob_nothing], axis=0)
    return jax.nn.softmax(logits), v


def net_forward(params, x, a_t2s, a_s2t, ready_mask_np):
    # Data-dependent-size boolean gather resolved on host (index set is
    # static per call); everything else runs inside the jit above.
    ready_idx = jnp.asarray(np.flatnonzero(ready_mask_np), jnp.int32)
    return _net_forward_device(params, x, a_t2s, a_s2t, ready_idx)


# ---------------------------------------------------------------------------
# Deterministic parameter / input construction
# ---------------------------------------------------------------------------
def make_params(key, input_dim):
    ks = jax.random.split(key, 14)
    s = 0.1

    def w(k, shape):
        return jax.random.normal(k, shape, jnp.float32) * s

    return {
        "w_succ1": w(ks[0], (input_dim, 128)), "b_succ1": w(ks[1], (128,)),
        "w_succ2": w(ks[2], (128, 128)),       "b_succ2": w(ks[3], (128,)),
        "w_pred1": w(ks[4], (128, 128)),       "b_pred1": w(ks[5], (128,)),
        "w_succ3": w(ks[6], (128, 128)),       "b_succ3": w(ks[7], (128,)),
        "w_probs": w(ks[8], (128, 1)),         "b_probs": w(ks[9], (1,)),
        "w_nothing": w(ks[10], (128, 1)),      "b_nothing": w(ks[11], (1,)),
        "w_value": w(ks[12], (128, 1)),        "b_value": w(ks[13], (1,)),
    }


if __name__ == "__main__":
    key = jax.random.PRNGKey(0)
    k_param, k_x, k_edge, k_ready = jax.random.split(key, 4)

    num_nodes = 16
    input_dim = 32
    num_edges = 32

    params = make_params(k_param, input_dim)
    x = jax.random.normal(k_x, (num_nodes, input_dim), jnp.float32)

    # deterministic random directed edges (2, E)
    edge_np = np.array(
        jax.random.randint(k_edge, (2, num_edges), 0, num_nodes), dtype=np.int64
    )
    # ready flags, shape (N, 1) like the PyTorch module expects
    ready_np = np.array(
        jax.random.bernoulli(k_ready, 0.5, (num_nodes, 1)), dtype=bool
    )
    if not ready_np.any():
        ready_np[0, 0] = True
    ready_mask = ready_np.squeeze(1)

    # Build the two normalized adjacencies ONCE per graph and reuse them for
    # every forward (hoisted out of net_forward per the perf review).
    a_t2s = gcn_norm_dense(edge_np, num_nodes, flow="target_to_source")
    a_s2t = gcn_norm_dense(edge_np, num_nodes, flow="source_to_target")

    probs, v = net_forward(params, x, a_t2s, a_s2t, ready_mask)
    jax.block_until_ready((probs, v))

    assert probs.shape == (int(ready_mask.sum()) + 1,)
    assert v.shape == (1,)
    assert abs(float(jnp.sum(probs)) - 1.0) < 1e-5

    print("KERNEL_OK")
</pallas_src>

<mosaic_0001>
module attributes {stable_mosaic.version = 11 : i64} {
  func.func @_fused_net_kernel(%arg0: memref<16x16xf32, #tpu.memory_space<vmem>>, %arg1: memref<16x16xf32, #tpu.memory_space<vmem>>, %arg2: memref<16x32xf32, #tpu.memory_space<vmem>>, %arg3: memref<32x128xf32, #tpu.memory_space<vmem>>, %arg4: memref<1x128xf32, #tpu.memory_space<vmem>>, %arg5: memref<128x128xf32, #tpu.memory_space<vmem>>, %arg6: memref<1x128xf32, #tpu.memory_space<vmem>>, %arg7: memref<128x128xf32, #tpu.memory_space<vmem>>, %arg8: memref<1x128xf32, #tpu.memory_space<vmem>>, %arg9: memref<128x128xf32, #tpu.memory_space<vmem>>, %arg10: memref<1x128xf32, #tpu.memory_space<vmem>>, %arg11: memref<128x1xf32, #tpu.memory_space<vmem>>, %arg12: memref<1x1xf32, #tpu.memory_space<vmem>>, %arg13: memref<128x2xf32, #tpu.memory_space<vmem>>, %arg14: memref<1x2xf32, #tpu.memory_space<vmem>>, %arg15: memref<16x1xf32, #tpu.memory_space<vmem>>, %arg16: memref<1x2xf32, #tpu.memory_space<vmem>>) attributes {dimension_semantics = [], scalar_prefetch = 0 : i64, scratch_operands = 0 : i64, tpu.core_type = #tpu.core_type<tc>} {
    %c0 = arith.constant 0 : index
    %c0_0 = arith.constant 0 : index
    %0 = vector.load %arg0[%c0, %c0_0] : memref<16x16xf32, #tpu.memory_space<vmem>>, vector<16x16xf32>
    %c0_1 = arith.constant 0 : index
    %c0_2 = arith.constant 0 : index
    %1 = vector.load %arg1[%c0_1, %c0_2] : memref<16x16xf32, #tpu.memory_space<vmem>>, vector<16x16xf32>
    %c0_3 = arith.constant 0 : index
    %c0_4 = arith.constant 0 : index
    %2 = vector.load %arg2[%c0_3, %c0_4] : memref<16x32xf32, #tpu.memory_space<vmem>>, vector<16x32xf32>
    %cst = arith.constant dense<0.000000e+00> : vector<16x32xf32>
    %3 = tpu.matmul %0, %2, %cst {dimension_numbers = #tpu.dot_dimension_numbers<[1], [0], [0], [1], [0, 0, 1, 1], [], []>} : vector<16x16xf32>, vector<16x32xf32>, vector<16x32xf32> -> vector<16x32xf32>
    %c0_5 = arith.constant 0 : index
    %c0_6 = arith.constant 0 : index
    %4 = vector.load %arg3[%c0_5, %c0_6] : memref<32x128xf32, #tpu.memory_space<vmem>>, vector<32x128xf32>
    %cst_7 = arith.constant dense<0.000000e+00> : vector<16x128xf32>
    %5 = tpu.matmul %3, %4, %cst_7 {dimension_numbers = #tpu.dot_dimension_numbers<[1], [0], [0], [1], [0, 0, 1, 1], [], []>} : vector<16x32xf32>, vector<32x128xf32>, vector<16x128xf32> -> vector<16x128xf32>
    %c0_8 = arith.constant 0 : index
    %c0_9 = arith.constant 0 : index
    %6 = vector.load %arg4[%c0_8, %c0_9] : memref<1x128xf32, #tpu.memory_space<vmem>>, vector<1x128xf32>
    %7 = vector.broadcast %6 : vector<1x128xf32> to vector<16x128xf32>
    %8 = arith.addf %5, %7 : vector<16x128xf32>
    %cst_10 = arith.constant 0.000000e+00 : f32
    %9 = vector.broadcast %cst_10 : f32 to vector<16x128xf32>
    %10 = arith.maximumf %8, %9 : vector<16x128xf32>
    %c0_11 = arith.constant 0 : index
    %c0_12 = arith.constant 0 : index
    %11 = vector.load %arg5[%c0_11, %c0_12] : memref<128x128xf32, #tpu.memory_space<vmem>>, vector<128x128xf32>
    %cst_13 = arith.constant dense<0.000000e+00> : vector<16x128xf32>
    %12 = tpu.matmul %10, %11, %cst_13 {dimension_numbers = #tpu.dot_dimension_numbers<[1], [0], [0], [1], [0, 0, 1, 1], [], []>} : vector<16x128xf32>, vector<128x128xf32>, vector<16x128xf32> -> vector<16x128xf32>
    %cst_14 = arith.constant dense<0.000000e+00> : vector<16x128xf32>
    %13 = tpu.matmul %0, %12, %cst_14 {dimension_numbers = #tpu.dot_dimension_numbers<[1], [0], [0], [1], [0, 0, 1, 1], [], []>} : vector<16x16xf32>, vector<16x128xf32>, vector<16x128xf32> -> vector<16x128xf32>
    %c0_15 = arith.constant 0 : index
    %c0_16 = arith.constant 0 : index
    %14 = vector.load %arg6[%c0_15, %c0_16] : memref<1x128xf32, #tpu.memory_space<vmem>>, vector<1x128xf32>
    %15 = vector.broadcast %14 : vector<1x128xf32> to vector<16x128xf32>
    %16 = arith.addf %13, %15 : vector<16x128xf32>
    %cst_17 = arith.constant 0.000000e+00 : f32
    %17 = vector.broadcast %cst_17 : f32 to vector<16x128xf32>
    %18 = arith.maximumf %16, %17 : vector<16x128xf32>
    %c0_18 = arith.constant 0 : index
    %c0_19 = arith.constant 0 : index
    %19 = vector.load %arg7[%c0_18, %c0_19] : memref<128x128xf32, #tpu.memory_space<vmem>>, vector<128x128xf32>
    %cst_20 = arith.constant dense<0.000000e+00> : vector<16x128xf32>
    %20 = tpu.matmul %18, %19, %cst_20 {dimension_numbers = #tpu.dot_dimension_numbers<[1], [0], [0], [1], [0, 0, 1, 1], [], []>} : vector<16x128xf32>, vector<128x128xf32>, vector<16x128xf32> -> vector<16x128xf32>
    %cst_21 = arith.constant dense<0.000000e+00> : vector<16x128xf32>
    %21 = tpu.matmul %1, %20, %cst_21 {dimension_numbers = #tpu.dot_dimension_numbers<[1], [0], [0], [1], [0, 0, 1, 1], [], []>} : vector<16x16xf32>, vector<16x128xf32>, vector<16x128xf32> -> vector<16x128xf32>
    %c0_22 = arith.constant 0 : index
    %c0_23 = arith.constant 0 : index
    %22 = vector.load %arg8[%c0_22, %c0_23] : memref<1x128xf32, #tpu.memory_space<vmem>>, vector<1x128xf32>
    %23 = vector.broadcast %22 : vector<1x128xf32> to vector<16x128xf32>
    %24 = arith.addf %21, %23 : vector<16x128xf32>
    %cst_24 = arith.constant 0.000000e+00 : f32
    %25 = vector.broadcast %cst_24 : f32 to vector<16x128xf32>
    %26 = arith.maximumf %24, %25 : vector<16x128xf32>
    %c0_25 = arith.constant 0 : index
    %c0_26 = arith.constant 0 : index
    %27 = vector.load %arg9[%c0_25, %c0_26] : memref<128x128xf32, #tpu.memory_space<vmem>>, vector<128x128xf32>
    %cst_27 = arith.constant dense<0.000000e+00> : vector<16x128xf32>
    %28 = tpu.matmul %26, %27, %cst_27 {dimension_numbers = #tpu.dot_dimension_numbers<[1], [0], [0], [1], [0, 0, 1, 1], [], []>} : vector<16x128xf32>, vector<128x128xf32>, vector<16x128xf32> -> vector<16x128xf32>
    %cst_28 = arith.constant dense<0.000000e+00> : vector<16x128xf32>
    %29 = tpu.matmul %0, %28, %cst_28 {dimension_numbers = #tpu.dot_dimension_numbers<[1], [0], [0], [1], [0, 0, 1, 1], [], []>} : vector<16x16xf32>, vector<16x128xf32>, vector<16x128xf32> -> vector<16x128xf32>
    %c0_29 = arith.constant 0 : index
    %c0_30 = arith.constant 0 : index
    %30 = vector.load %arg10[%c0_29, %c0_30] : memref<1x128xf32, #tpu.memory_space<vmem>>, vector<1x128xf32>
    %31 = vector.broadcast %30 : vector<1x128xf32> to vector<16x128xf32>
    %32 = arith.addf %29, %31 : vector<16x128xf32>
    %cst_31 = arith.constant 0.000000e+00 : f32
    %33 = vector.broadcast %cst_31 : f32 to vector<16x128xf32>
    %34 = arith.maximumf %32, %33 : vector<16x128xf32>
    %c0_32 = arith.constant 0 : index
    %c0_33 = arith.constant 0 : index
    %35 = vector.load %arg11[%c0_32, %c0_33] : memref<128x1xf32, #tpu.memory_space<vmem>>, vector<128x1xf32>
    %cst_34 = arith.constant dense<0.000000e+00> : vector<16x1xf32>
    %36 = tpu.matmul %34, %35, %cst_34 {dimension_numbers = #tpu.dot_dimension_numbers<[1], [0], [0], [1], [0, 0, 1, 1], [], []>} : vector<16x128xf32>, vector<128x1xf32>, vector<16x1xf32> -> vector<16x1xf32>
    %cst_35 = arith.constant dense<0.000000e+00> : vector<16x1xf32>
    %37 = tpu.matmul %0, %36, %cst_35 {dimension_numbers = #tpu.dot_dimension_numbers<[1], [0], [0], [1], [0, 0, 1, 1], [], []>} : vector<16x16xf32>, vector<16x1xf32>, vector<16x1xf32> -> vector<16x1xf32>
    %c0_36 = arith.constant 0 : index
    %c0_37 = arith.constant 0 : index
    %38 = vector.load %arg12[%c0_36, %c0_37] : memref<1x1xf32, #tpu.memory_space<vmem>>, vector<1x1xf32>
    %39 = vector.broadcast %38 : vector<1x1xf32> to vector<16x1xf32>
    %40 = arith.addf %37, %39 : vector<16x1xf32>
    %c0_38 = arith.constant 0 : index
    %c0_39 = arith.constant 0 : index
    %41 = vector.load %arg15[%c0_38, %c0_39] : memref<16x1xf32, #tpu.memory_space<vmem>>, vector<16x1xf32>
    tpu.vector_store %arg15[%c0_38, %c0_39], %40 {strides = array<i32>} : memref<16x1xf32, #tpu.memory_space<vmem>>, vector<16x1xf32>,
    %cst_40 = arith.constant dense<0.000000e+00> : vector<128xf32>
    %42 = vector.multi_reduction <add>, %34, %cst_40 [0] : vector<16x128xf32> to vector<128xf32>
    %43 = vector.shape_cast %42 : vector<128xf32> to vector<1x128xf32>
    %cst_41 = arith.constant 1.600000e+01 : f32
    %44 = vector.broadcast %cst_41 : f32 to vector<1x128xf32>
    %45 = arith.divf %43, %44 : vector<1x128xf32>
    %c0_42 = arith.constant 0 : index
    %c0_43 = arith.constant 0 : index
    %46 = vector.load %arg13[%c0_42, %c0_43] : memref<128x2xf32, #tpu.memory_space<vmem>>, vector<128x2xf32>
    %cst_44 = arith.constant dense<0.000000e+00> : vector<1x2xf32>
    %47 = tpu.matmul %45, %46, %cst_44 {dimension_numbers = #tpu.dot_dimension_numbers<[1], [0], [0], [1], [0, 0, 1, 1], [], []>} : vector<1x128xf32>, vector<128x2xf32>, vector<1x2xf32> -> vector<1x2xf32>
    %c0_45 = arith.constant 0 : index
    %c0_46 = arith.constant 0 : index
    %48 = vector.load %arg14[%c0_45, %c0_46] : memref<1x2xf32, #tpu.memory_space<vmem>>, vector<1x2xf32>
    %49 = arith.addf %47, %48 : vector<1x2xf32>
    %c0_47 = arith.constant 0 : index
    %c0_48 = arith.constant 0 : index
    %50 = vector.load %arg16[%c0_47, %c0_48] : memref<1x2xf32, #tpu.memory_space<vmem>>, vector<1x2xf32>
    tpu.vector_store %arg16[%c0_47, %c0_48], %49 {strides = array<i32>} : memref<1x2xf32, #tpu.memory_space<vmem>>, vector<1x2xf32>,
    return
  }
}

</mosaic_0001>

<bundles_post_ra>
// kernel: _net_forward_device.1
= control target key start
LH: loop header
LB: loop body
LE: loop exit
PB: predicated region body
PF: predicated region fallthrough
CT: control target
= control target key end

     0   :  { %s2012_s0 = inlined_call_operand.hbm [shape: f32[16,16], index: 0, kind: input, shape index: {}]   ;;  %s2013_s1 = inlined_call_operand.hbm [shape: f32[16,16], index: 1, kind: input, shape index: {}]   ;;  %s2014_s2 = inlined_call_operand.hbm [shape: f32[16,32], index: 2, kind: input, shape index: {}]   ;;  %s2015_s3 = inlined_call_operand.vmem [shape: f32[32,128], index: 3, kind: input, shape index: {}]   ;;  %s2016_s4 = inlined_call_operand.vmem [shape: f32[1,128], index: 4, kind: input, shape index: {}]   ;;  %s2017_s5 = inlined_call_operand.vmem [shape: f32[128,128], index: 5, kind: input, shape index: {}]   ;;  %s2018_s6 = inlined_call_operand.vmem [shape: f32[1,128], index: 6, kind: input, shape index: {}]   ;;  %s2019_s7 = inlined_call_operand.vmem [shape: f32[128,128], index: 7, kind: input, shape index: {}]   ;;  %s2020_s8 = inlined_call_operand.hbm [shape: f32[1,128], index: 8, kind: input, shape index: {}]   ;;  %s2021_s9 = inlined_call_operand.hbm [shape: f32[128,128], index: 9, kind: input, shape index: {}]   ;;  %s2022_s10 = inlined_call_operand.hbm [shape: f32[1,128], index: 10, kind: input, shape index: {}]   ;;  %s2023_s11 = inlined_call_operand.vmem [shape: f32[128,1], index: 11, kind: input, shape index: {}]   ;;  %s2024_s12 = inlined_call_operand.<no memory space> [shape: f32[1,1], index: 12, kind: input, shape index: {}]   ;;  %s2025_s13 = inlined_call_operand.vmem [shape: f32[128,2], index: 13, kind: input, shape index: {}]   ;;  %s2026_s14 = inlined_call_operand.vmem [shape: f32[1,2], index: 14, kind: input, shape index: {}]   ;;  %s2027_s15 = inlined_call_operand.vmem [shape: f32[16,1], index: 15, kind: output, shape index: {0}]   ;;  %s2028_s16 = inlined_call_operand.vmem [shape: f32[1,2], index: 16, kind: output, shape index: {1}]  }
   0x1   :  { %2029 = sst [smem:[#allocation17_spill]] %s2012_s0  ;;  %v22_v0 = vstv %s2024_s12 }
   0x2   :  { %23 = vst [vmem:[#allocation2] sm:$0x1] %v22_v0 }
   0x3   :  { %24 = vsyncpa [#allocation4], 0 }
   0x4   :  { %25 = vsyncpa [#allocation6], 0 }
   0x5   :  { %26 = vsyncpa [#allocation9], 0 }
   0x6   :  { %27 = vsyncpa [#allocation12], 0  ;;  %s1623_s23 = smov [#allocation5]   ;;  %s1624_s25 = smov [#allocation8]  }
   0x7   :  { %s45_s24 = sshll.u32 %s1623_s23, 4  ;;  %s80_s26 = sshll.u32 %s1624_s25, 4  ;;  %s46_s24 = int_to_ptr.vmem [resolvable:$true] %s45_s24  ;;  %s81_s26 = int_to_ptr.vmem [resolvable:$true] %s80_s26 }
   0x8   :  { %s1503_s27 = scalar_lea.vmem %s46_s24, 256  ;;  %p1508_p1 = scmp.lt.s32.totalorder %s46_s24, %s46_s24 }
   0x9   :  { %p1504_p0 = scmp.ne.s32.totalorder %s46_s24, %s1503_s27  ;;  %p1509_p2 = scmp.lt.s32.totalorder %s1503_s27, %s1503_s27 }
   0xb   :  { %p1510_p3 = por %p1509_p2, %p1508_p1 }
   0xd   :  { %p1511_p4 = pnand %p1510_p3, %p1504_p0 }
   0xf   :  { %1514 = shalt.err (!%p1511_p4)
}
  0x10   :  { %s1625_s28 = smov 128   ;;  %s1626_s12 = smov 8  }
  0x11   :  { %51 = dma.hbm_to_vmem [thread:$0]  %s2013_s1, 256, %s46_s24, [#allocation6], %s1625_s28, %s1625_s28, %s1626_s12  }
  0x12   :  { %s1523_s0 = scalar_lea.vmem %s81_s26, 16  ;;  %s1527_s17 = scalar_lea.vmem %s81_s26, 32 }
  0x13   :  { %p1524_p5 = scmp.ne.s32.totalorder %s81_s26, %s1523_s0  ;;  %p1528_p6 = scmp.lt.s32.totalorder %s81_s26, %s81_s26 }
  0x14   :  { %p1529_p7 = scmp.lt.s32.totalorder %s1527_s17, %s1523_s0 }
  0x16   :  { %p1530_p8 = por %p1529_p7, %p1528_p6 }
  0x18   :  { %p1531_p9 = pnand %p1530_p8, %p1524_p5 }
  0x1a   :  { %1534 = shalt.err (!%p1531_p9)
}
  0x1b   :  { %83 = dma.hbm_to_vmem [thread:$0]  %s2020_s8, 16, %s81_s26, [#allocation9]  }
  0x1c   :  { %s1627_s20 = smov [#allocation3]   ;;  %s1628_s22 = smov [#allocation7]  }
  0x1d   :  { %s33_s21 = sshll.u32 %s1627_s20, 4  ;;  %s57_s23 = sshll.u32 %s1628_s22, 4  ;;  %s34_s21 = int_to_ptr.vmem [resolvable:$true] %s33_s21  ;;  %s58_s23 = int_to_ptr.vmem [resolvable:$true] %s57_s23 }
  0x1e   :  { %s1543_s25 = scalar_lea.vmem %s34_s21, 256  ;;  %p1548_p11 = scmp.lt.s32.totalorder %s34_s21, %s34_s21 }
  0x1f   :  { %p1544_p10 = scmp.ne.s32.totalorder %s34_s21, %s1543_s25  ;;  %p1549_p12 = scmp.lt.s32.totalorder %s1543_s25, %s1543_s25 }
  0x21   :  { %p1550_p13 = por %p1549_p12, %p1548_p11 }
  0x23   :  { %p1551_p0 = pnand %p1550_p13, %p1544_p10 }
  0x25   :  { %1554 = shalt.err (!%p1551_p0)
}
  0x26   :  { %s2030_s27 = sld [smem:[#allocation17_spill]]  ;;  %s1563_s8 = scalar_lea.vmem %s58_s23, 256 }
  0x27   :  { %p1564_p1 = scmp.ne.s32.totalorder %s58_s23, %s1563_s8  ;;  %p1568_p2 = scmp.lt.s32.totalorder %s58_s23, %s58_s23 }
  0x28   :  { %p1569_p3 = scmp.lt.s32.totalorder %s1563_s8, %s1563_s8 }
  0x2a   :  { %p1570_p4 = por %p1569_p3, %p1568_p2 }
  0x2c   :  { %39 = dma.hbm_to_vmem [thread:$0]  %s2030_s27, 256, %s34_s21, [#allocation4], %s1625_s28, %s1625_s28, %s1626_s12  }
  0x2d   :  { %p1571_p5 = pnand %p1570_p4, %p1564_p1 }
  0x2f   :  { %1574 = shalt.err (!%p1571_p5)
}
  0x30   :  { %63 = dma.hbm_to_vmem [thread:$0]  %s2014_s2, 256, %s58_s23, [#allocation6], %s1625_s28, %s1625_s28, %s1626_s12  }
  0x31   :  { %s1629_s30 = smov [#allocation10]   ;;  %s1630_s17 = smov [#allocation11]  }
  0x32   :  { %s89_s0 = sshll.u32 %s1629_s30, 4  ;;  %s102_s18 = sshll.u32 %s1630_s17, 4  ;;  %s90_s0 = int_to_ptr.vmem [resolvable:$true] %s89_s0  ;;  %s103_s18 = int_to_ptr.vmem [resolvable:$true] %s102_s18 }
  0x33   :  { %s1583_s19 = scalar_lea.vmem %s90_s0, 2048  ;;  %p1588_p7 = scmp.lt.s32.totalorder %s90_s0, %s90_s0 }
  0x34   :  { %p1584_p6 = scmp.ne.s32.totalorder %s90_s0, %s1583_s19  ;;  %p1589_p8 = scmp.lt.s32.totalorder %s1583_s19, %s1583_s19 }
  0x36   :  { %p1590_p9 = por %p1589_p8, %p1588_p7 }
  0x38   :  { %p1591_p10 = pnand %p1590_p9, %p1584_p6 }
  0x3a   :  { %1594 = shalt.err (!%p1591_p10)
}
  0x3b   :  { %95 = dma.hbm_to_vmem [thread:$0]  %s2021_s9, 2048, %s90_s0, [#allocation9], %s1625_s28, %s1625_s28, %s1626_s12  }
  0x3c   :  { %s1603_s2 = scalar_lea.vmem %s103_s18, 16  ;;  %s1607_s22 = scalar_lea.vmem %s103_s18, 32 }
  0x3d   :  { %p1604_p11 = scmp.ne.s32.totalorder %s103_s18, %s1603_s2  ;;  %p1608_p12 = scmp.lt.s32.totalorder %s103_s18, %s103_s18 }
  0x3e   :  { %p1609_p13 = scmp.lt.s32.totalorder %s1607_s22, %s1603_s2 }
  0x40   :  { %p1610_p0 = por %p1609_p13, %p1608_p12 }
  0x42   :  { %p1611_p1 = pnand %p1610_p0, %p1604_p11 }
  0x44   :  { %1614 = shalt.err (!%p1611_p1)
}
  0x45   :  { %105 = dma.hbm_to_vmem [thread:$0]  %s2022_s10, 16, %s103_s18, [#allocation12]  }
  0x46   :  { %1615 = dma.done.wait [#allocation4], 256  }
  0x47   :  { %1616 = vsyncadd [#allocation4], 4294967040 }
  0x48   :  { %1617 = dma.done.wait [#allocation6], 512  }
  0x49   :  { %1618 = vsyncadd [#allocation6], 4294966784 }
  0x4a   :  { %1619 = dma.done.wait [#allocation9], 2064  }
  0x4b   :  { %1620 = vsyncadd [#allocation9], 4294965232 }
  0x4c   :  { %1621 = dma.done.wait [#allocation12], 16  }
  0x4d   :  { %1622 = vsyncadd [#allocation12], 4294967280  ;;  %vm138_vm0 = vcmask 130048   ;;  %v137_v1 = vld [vmem:[#allocation7 + $0x8] sm:$0xff]  ;;  %v136_v2 = vld [vmem:[#allocation7] sm:$0xff]  ;;  %vm231_vm1 = vcmask 261120  }
  0x4e   :  { %v1751_v3 = vld [vmem:[#allocation3] sm:$0xff]  ;;  %1264 = vmatprep.subr.mxu1 %v137_v1  ;;  %v1755_v4 = vld [vmem:[#allocation3 + $0x8] sm:$0xff]  ;;  %v223_v5 = vld [vmem:[%s2015_s3 + $0x18] sm:$0xff]  ;;  %vm1632_vm2 = vmmov 0   ;;  %vm1118_vm3 = vcmask 8192   ;;  %vm1019_vm4 = vcmask 7168  }
  0x4f   :  { %1268 = vmatprep.mubr.msk.f32.mxu1 %vm138_vm0, %v1751_v3  ;;  %1265 = vmatpush3.msra.mxu1 %v137_v1  ;;  %v222_v6 = vld [vmem:[%s2015_s3 + $0x10] sm:$0xff]  ;;  %v221_v7 = vld [vmem:[%s2015_s3 + $0x8] sm:$0xff]  ;;  %v220_v8 = vld [vmem:[%s2015_s3] sm:$0xff] }
  0x50   :  { %1266 = vmatprep.subr.mxu1 %v136_v2  ;;  %v330_v9 = vld [vmem:[%s2017_s5 + $0x78] sm:$0xff]  ;;  %v329_v10 = vld [vmem:[%s2017_s5 + $0x70] sm:$0xff]  ;;  %v328_v11 = vld [vmem:[%s2017_s5 + $0x68] sm:$0xff] }
  0x51   :  { %1267 = vmatpush3.msra.mxu1 %v136_v2  ;;  %1282 = vmatprep.subr.mxu0 %v330_v9  ;;  %v327_v12 = vld [vmem:[%s2017_s5 + $0x60] sm:$0xff]  ;;  %v326_v13 = vld [vmem:[%s2017_s5 + $0x58] sm:$0xff]  ;;  %v325_v14 = vld [vmem:[%s2017_s5 + $0x50] sm:$0xff] }
  0x52   :  { %1269 = vmatmul.mubr.msk.f32.vlgmr.msra.gmra.mxu1 %vm138_vm0, %v1755_v4  ;;  %1271 = vmatprep.subr.mxu1 %v223_v5  ;;  %v324_v15 = vld [vmem:[%s2017_s5 + $0x48] sm:$0xff]  ;;  %v323_v16 = vld [vmem:[%s2017_s5 + $0x40] sm:$0xff]  ;;  %v322_v17 = vld [vmem:[%s2017_s5 + $0x38] sm:$0xff] }
  0x53   :  { %1272 = vmatpush3.msra.mxu1 %v223_v5  ;;  %1283 = vmatpush3.msra.mxu0 %v330_v9  ;;  %v321_v18 = vld [vmem:[%s2017_s5 + $0x30] sm:$0xff]  ;;  %v320_v19 = vld [vmem:[%s2017_s5 + $0x28] sm:$0xff]  ;;  %v319_v20 = vld [vmem:[%s2017_s5 + $0x20] sm:$0xff] }
  0x54   :  { %1273 = vmatprep.subr.mxu1 %v222_v6  ;;  %1284 = vmatprep.subr.mxu0 %v329_v10  ;;  %v318_v23 = vld [vmem:[%s2017_s5 + $0x18] sm:$0xff]  ;;  %v317_v24 = vld [vmem:[%s2017_s5 + $0x10] sm:$0xff]  ;;  %v316_v25 = vld [vmem:[%s2017_s5 + $0x8] sm:$0xff] }
  0x55   :  { %1274 = vmatpush3.msra.mxu1 %v222_v6  ;;  %1285 = vmatpush3.msra.mxu0 %v329_v10  ;;  %v315_v26 = vld [vmem:[%s2017_s5] sm:$0xff]  ;;  %v505_v36 = vld [vmem:[%s2019_s7 + $0x78] sm:$0xff]  ;;  %v504_v37 = vld [vmem:[%s2019_s7 + $0x70] sm:$0xff] }
  0x56   :  { %1275 = vmatprep.subr.mxu1 %v221_v7  ;;  %1286 = vmatprep.subr.mxu0 %v328_v11  ;;  %v1134_v27 = vld [vmem:[%s2016_s4] ss:$0 sm:$0xff]  ;;  %v503_v38 = vld [vmem:[%s2019_s7 + $0x68] sm:$0xff]  ;;  %v501_v40 = vld [vmem:[%s2019_s7 + $0x58] sm:$0xff] }
  0x57   :  { %1276 = vmatpush3.msra.mxu1 %v221_v7  ;;  %1287 = vmatpush3.msra.mxu0 %v328_v11  ;;  %v502_v39 = vld [vmem:[%s2019_s7 + $0x60] sm:$0xff]  ;;  %v500_v41 = vld [vmem:[%s2019_s7 + $0x50] sm:$0xff]  ;;  %v499_v42 = vld [vmem:[%s2019_s7 + $0x48] sm:$0xff] }
  0x58   :  { %1277 = vmatprep.subr.mxu1 %v220_v8  ;;  %1288 = vmatprep.subr.mxu0 %v327_v12  ;;  %v498_v43 = vld [vmem:[%s2019_s7 + $0x40] sm:$0xff]  ;;  %v497_v44 = vld [vmem:[%s2019_s7 + $0x38] sm:$0xff]  ;;  %v496_v45 = vld [vmem:[%s2019_s7 + $0x30] sm:$0xff] }
  0x59   :  { %1278 = vmatpush3.msra.mxu1 %v220_v8  ;;  %1289 = vmatpush3.msra.mxu0 %v327_v12  ;;  %v495_v46 = vld [vmem:[%s2019_s7 + $0x28] sm:$0xff]  ;;  %v494_v47 = vld [vmem:[%s2019_s7 + $0x20] sm:$0xff]  ;;  %v493_v48 = vld [vmem:[%s2019_s7 + $0x18] sm:$0xff] }
  0x5a   :  { %1290 = vmatprep.subr.mxu0 %v326_v13  ;;  %v492_v49 = vld [vmem:[%s2019_s7 + $0x10] sm:$0xff]  ;;  %v491_v50 = vld [vmem:[%s2019_s7 + $0x8] sm:$0xff]  ;;  %v490_v51 = vld [vmem:[%s2019_s7] sm:$0xff] }
  0x5b   :  { %1291 = vmatpush3.msra.mxu0 %v326_v13  ;;  %v1137_v52 = vld [vmem:[%s2018_s6] ss:$0 sm:$0xff]  ;;  %v134_v59 = vld [vmem:[#allocation5] sm:$0xff]  ;;  %v685_v61 = vld [vmem:[#allocation10 + $0x70] sm:$0xff] }
  0x5c   :  { %1292 = vmatprep.subr.mxu0 %v325_v14  ;;  %v686_v60 = vld [vmem:[#allocation10 + $0x78] sm:$0xff]  ;;  %v684_v62 = vld [vmem:[#allocation10 + $0x68] sm:$0xff]  ;;  %v683_v63 = vld [vmem:[#allocation10 + $0x60] sm:$0xff] }
  0x5d   :  { %1293 = vmatpush3.msra.mxu0 %v325_v14  ;;  %v682_v0 = vld [vmem:[#allocation10 + $0x58] sm:$0xff]  ;;  %v681_v1 = vld [vmem:[#allocation10 + $0x50] sm:$0xff]  ;;  %v680_v2 = vld [vmem:[#allocation10 + $0x48] sm:$0xff] }
  0x5e   :  { %1294 = vmatprep.subr.mxu0 %v324_v15  ;;  %v679_v5 = vld [vmem:[#allocation10 + $0x40] sm:$0xff]  ;;  %v678_v6 = vld [vmem:[#allocation10 + $0x38] sm:$0xff]  ;;  %v677_v7 = vld [vmem:[#allocation10 + $0x30] sm:$0xff] }
  0x5f   :  { %1295 = vmatpush3.msra.mxu0 %v324_v15  ;;  %v676_v8 = vld [vmem:[#allocation10 + $0x28] sm:$0xff]  ;;  %v675_v9 = vld [vmem:[#allocation10 + $0x20] sm:$0xff]  ;;  %v674_v13 = vld [vmem:[#allocation10 + $0x18] sm:$0xff] }
  0x60   :  { %1296 = vmatprep.subr.mxu0 %v323_v16  ;;  %v135_v12 = vld [vmem:[#allocation5 + $0x8] sm:$0xff]  ;;  %v673_v14 = vld [vmem:[#allocation10 + $0x10] sm:$0xff] }
  0x61   :  { %1297 = vmatpush3.msra.mxu0 %v323_v16  ;;  %v672_v15 = vld [vmem:[#allocation10 + $0x8] sm:$0xff]  ;;  %v671_v16 = vld [vmem:[#allocation10] sm:$0xff] }
  0x62   :  { %1298 = vmatprep.subr.mxu0 %v322_v17 }
  0x63   :  { %1299 = vmatpush3.msra.mxu0 %v322_v17  ;;  %v1140_v17 = vld [vmem:[#allocation8] ss:$0 sm:$0xff] }
  0x64   :  { %1300 = vmatprep.subr.mxu0 %v321_v18 }
  0x65   :  { %1301 = vmatpush3.msra.mxu0 %v321_v18 }
  0x66   :  { %1302 = vmatprep.subr.mxu0 %v320_v19 }
  0x67   :  { %1303 = vmatpush3.msra.mxu0 %v320_v19 }
  0x68   :  { %1304 = vmatprep.subr.mxu0 %v319_v20 }
  0x69   :  { %1305 = vmatpush3.msra.mxu0 %v319_v20 }
  0x6a   :  { %1306 = vmatprep.subr.mxu0 %v318_v23 }
  0x6b   :  { %1307 = vmatpush3.msra.mxu0 %v318_v23 }
  0x6c   :  { %1308 = vmatprep.subr.mxu0 %v317_v24 }
  0x6d   :  { %1309 = vmatpush3.msra.mxu0 %v317_v24  ;;  %v1631_v24 = vmov 0.0  }
  0x6e   :  { %1310 = vmatprep.subr.mxu0 %v316_v25 }
  0x6f   :  { %1311 = vmatpush3.msra.mxu0 %v316_v25  ;;  %v1046_v25 = vld [vmem:[%s2025_s13 + $0x78] sm:$0xff] }
  0x70   :  { %1312 = vmatprep.subr.mxu0 %v315_v26 }
  0x71   :  { %1313 = vmatpush3.msra.mxu0 %v315_v26  ;;  %v1045_v26 = vld [vmem:[%s2025_s13 + $0x70] sm:$0xff] }
  0x72   :  { %1366 = vmatprep.subr.mxu0 %v686_v60 }
 0x112   :  { %v1270_v21 = vpop.f32.mrf.mxu1 }
 0x114   :  { %v211_v22 = vpop.f32.mrf.mxu1 }
 0x115   :  { %1279 = vmatprep.mubr.msk.f32.mxu1 %vm231_vm1, %v211_v22 }
 0x116   :  { %1280 = vmatmul.mubr.msk.f32.vlgmr.msra.gmra.mxu1 %vm231_vm1, %v1270_v21 }
 0x117   :  { %1321 = vmatprep.mubr.msk.f32.mxu1 %vm138_vm0, %v1751_v3 }
 0x1d6   :  { %v1281_v28 = vpop.f32.mrf.mxu1 }
 0x1d7   :  { %v310_v29 = vadd.f32 %v1281_v28, %v1134_v27  ;;  %v1043_v28 = vld [vmem:[%s2025_s13 + $0x60] sm:$0xff] }
 0x1d8   :  { %v304_v30 = vpop.f32.mrf.mxu1 }
 0x1d9   :  { %v305_v31 = vadd.f32 %v1134_v27, %v304_v30  ;;  %v314_v33 = vmax.f32 %v310_v29, 0.0  ;;  %v1044_v27 = vld [vmem:[%s2025_s13 + $0x68] sm:$0xff] }
 0x1db   :  { %v313_v32 = vmax.f32 %v305_v31, 0.0  ;;  %v861_v31 = vld [vmem:[%s2023_s11 + $0x78] sm:$0xff] }
 0x1dd   :  { %1314 = vmatprep.mubr.f32.mxu0 %v313_v32  ;;  %v860_v32 = vld [vmem:[%s2023_s11 + $0x70] sm:$0xff] }
 0x1de   :  { %1315 = vmatmul.mubr.f32.vlgmr.msra.gmra.mxu0 %v314_v33  ;;  %v859_v33 = vld [vmem:[%s2023_s11 + $0x68] sm:$0xff] }
 0x1df   :  { %1367 = vmatpush3.msra.mxu0 %v686_v60 }
 0x1e0   :  { %1368 = vmatprep.subr.mxu0 %v685_v61 }
 0x1e1   :  { %1369 = vmatpush3.msra.mxu0 %v685_v61 }
 0x1e2   :  { %1370 = vmatprep.subr.mxu0 %v684_v62 }
 0x1e3   :  { %1371 = vmatpush3.msra.mxu0 %v684_v62 }
 0x1e4   :  { %1372 = vmatprep.subr.mxu0 %v683_v63 }
 0x1e5   :  { %1373 = vmatpush3.msra.mxu0 %v683_v63 }
 0x1e6   :  { %1374 = vmatprep.subr.mxu0 %v682_v0 }
 0x1e7   :  { %1375 = vmatpush3.msra.mxu0 %v682_v0 }
 0x1e8   :  { %1376 = vmatprep.subr.mxu0 %v681_v1 }
 0x1e9   :  { %1377 = vmatpush3.msra.mxu0 %v681_v1 }
 0x1ea   :  { %1378 = vmatprep.subr.mxu0 %v680_v2 }
 0x1eb   :  { %1379 = vmatpush3.msra.mxu0 %v680_v2 }
 0x1ec   :  { %1380 = vmatprep.subr.mxu0 %v679_v5 }
 0x1ed   :  { %1381 = vmatpush3.msra.mxu0 %v679_v5 }
 0x1ee   :  { %1382 = vmatprep.subr.mxu0 %v678_v6 }
 0x1ef   :  { %1383 = vmatpush3.msra.mxu0 %v678_v6 }
 0x1f0   :  { %1384 = vmatprep.subr.mxu0 %v677_v7 }
 0x1f1   :  { %1385 = vmatpush3.msra.mxu0 %v677_v7 }
 0x1f2   :  { %1386 = vmatprep.subr.mxu0 %v676_v8 }
 0x1f3   :  { %1387 = vmatpush3.msra.mxu0 %v676_v8 }
 0x1f4   :  { %1388 = vmatprep.subr.mxu0 %v675_v9 }
 0x1f5   :  { %1389 = vmatpush3.msra.mxu0 %v675_v9 }
 0x1f6   :  { %1390 = vmatprep.subr.mxu0 %v674_v13 }
 0x1f7   :  { %1391 = vmatpush3.msra.mxu0 %v674_v13 }
 0x1f8   :  { %1392 = vmatprep.subr.mxu0 %v673_v14 }
 0x1f9   :  { %1393 = vmatpush3.msra.mxu0 %v673_v14 }
 0x1fa   :  { %1394 = vmatprep.subr.mxu0 %v672_v15 }
 0x1fb   :  { %1395 = vmatpush3.msra.mxu0 %v672_v15 }
 0x1fc   :  { %1396 = vmatprep.subr.mxu0 %v671_v16 }
 0x1fd   :  { %1397 = vmatpush3.msra.mxu0 %v671_v16 }
 0x1fe   :  { %1450 = vmatprep.subr.mxu0 %v1631_v24 }
 0x29e   :  { %v1316_v34 = vpop.f32.mrf.mxu0 }
 0x29f   :  { %1317 = vmatprep.subr.mxu1 %v1316_v34 }
 0x2a0   :  { %v397_v35 = vpop.f32.mrf.mxu0  ;;  %1318 = vmatpush3.msra.mxu1 %v1316_v34  ;;  %v858_v34 = vld [vmem:[%s2023_s11 + $0x60] sm:$0xff] }
 0x2a1   :  { %1319 = vmatprep.subr.mxu1 %v397_v35 }
 0x2a2   :  { %1320 = vmatpush3.msra.mxu1 %v397_v35  ;;  %v857_v35 = vld [vmem:[%s2023_s11 + $0x58] sm:$0xff] }
 0x2a3   :  { %1322 = vmatmul.mubr.msk.f32.vlgmr.msra.gmra.mxu1 %vm138_vm0, %v1755_v4  ;;  %1324 = vmatprep.subr.mxu1 %v505_v36 }
 0x2a4   :  { %1325 = vmatpush3.msra.mxu1 %v505_v36  ;;  %v856_v36 = vld [vmem:[%s2023_s11 + $0x50] sm:$0xff] }
 0x2a5   :  { %1326 = vmatprep.subr.mxu1 %v504_v37 }
 0x2a6   :  { %1327 = vmatpush3.msra.mxu1 %v504_v37  ;;  %v855_v37 = vld [vmem:[%s2023_s11 + $0x48] sm:$0xff] }
 0x2a7   :  { %1328 = vmatprep.subr.mxu1 %v503_v38 }
 0x2a8   :  { %1329 = vmatpush3.msra.mxu1 %v503_v38  ;;  %v854_v38 = vld [vmem:[%s2023_s11 + $0x40] sm:$0xff] }
 0x2a9   :  { %1330 = vmatprep.subr.mxu1 %v502_v39 }
 0x2aa   :  { %1331 = vmatpush3.msra.mxu1 %v502_v39  ;;  %v853_v39 = vld [vmem:[%s2023_s11 + $0x38] sm:$0xff] }
 0x2ab   :  { %1332 = vmatprep.subr.mxu1 %v501_v40 }
 0x2ac   :  { %1333 = vmatpush3.msra.mxu1 %v501_v40  ;;  %v852_v40 = vld [vmem:[%s2023_s11 + $0x30] sm:$0xff] }
 0x2ad   :  { %1334 = vmatprep.subr.mxu1 %v500_v41 }
 0x2ae   :  { %1335 = vmatpush3.msra.mxu1 %v500_v41  ;;  %v851_v41 = vld [vmem:[%s2023_s11 + $0x28] sm:$0xff] }
 0x2af   :  { %1336 = vmatprep.subr.mxu1 %v499_v42 }
 0x2b0   :  { %1337 = vmatpush3.msra.mxu1 %v499_v42  ;;  %v850_v42 = vld [vmem:[%s2023_s11 + $0x20] sm:$0xff] }
 0x2b1   :  { %1338 = vmatprep.subr.mxu1 %v498_v43 }
 0x2b2   :  { %1339 = vmatpush3.msra.mxu1 %v498_v43  ;;  %v849_v43 = vld [vmem:[%s2023_s11 + $0x18] sm:$0xff] }
 0x2b3   :  { %1340 = vmatprep.subr.mxu1 %v497_v44 }
 0x2b4   :  { %1341 = vmatpush3.msra.mxu1 %v497_v44  ;;  %v1042_v44 = vld [vmem:[%s2025_s13 + $0x58] sm:$0xff] }
 0x2b5   :  { %1342 = vmatprep.subr.mxu1 %v496_v45 }
 0x2b6   :  { %1343 = vmatpush3.msra.mxu1 %v496_v45  ;;  %v848_v45 = vld [vmem:[%s2023_s11 + $0x10] sm:$0xff] }
 0x2b7   :  { %1344 = vmatprep.subr.mxu1 %v495_v46 }
 0x2b8   :  { %1345 = vmatpush3.msra.mxu1 %v495_v46  ;;  %v1041_v46 = vld [vmem:[%s2025_s13 + $0x50] sm:$0xff] }
 0x2b9   :  { %1346 = vmatprep.subr.mxu1 %v494_v47 }
 0x2ba   :  { %1347 = vmatpush3.msra.mxu1 %v494_v47  ;;  %v847_v47 = vld [vmem:[%s2023_s11 + $0x8] sm:$0xff] }
 0x2bb   :  { %1348 = vmatprep.subr.mxu1 %v493_v48 }
 0x2bc   :  { %1349 = vmatpush3.msra.mxu1 %v493_v48  ;;  %v1040_v48 = vld [vmem:[%s2025_s13 + $0x48] sm:$0xff] }
 0x2bd   :  { %1350 = vmatprep.subr.mxu1 %v492_v49 }
 0x2be   :  { %1351 = vmatpush3.msra.mxu1 %v492_v49  ;;  %v846_v49 = vld [vmem:[%s2023_s11] sm:$0xff] }
 0x2bf   :  { %1352 = vmatprep.subr.mxu1 %v491_v50 }
 0x2c0   :  { %1353 = vmatpush3.msra.mxu1 %v491_v50  ;;  %v1039_v50 = vld [vmem:[%s2025_s13 + $0x40] sm:$0xff] }
 0x2c1   :  { %1354 = vmatprep.subr.mxu1 %v490_v51 }
 0x2c2   :  { %1355 = vmatpush3.msra.mxu1 %v490_v51  ;;  %v1038_v51 = vld [vmem:[%s2025_s13 + $0x38] sm:$0xff] }
 0x363   :  { %v1323_v53 = vpop.f32.mrf.mxu1 }
 0x364   :  { %v485_v54 = vadd.f32 %v1323_v53, %v1137_v52  ;;  %v1036_v53 = vld [vmem:[%s2025_s13 + $0x28] sm:$0xff] }
 0x365   :  { %v479_v55 = vpop.f32.mrf.mxu1 }
 0x366   :  { %v480_v56 = vadd.f32 %v1137_v52, %v479_v55  ;;  %v489_v58 = vmax.f32 %v485_v54, 0.0  ;;  %v1037_v52 = vld [vmem:[%s2025_s13 + $0x30] sm:$0xff]  ;;  %v1035_v54 = vld [vmem:[%s2025_s13 + $0x20] sm:$0xff]  ;;  %v1034_v55 = vld [vmem:[%s2025_s13 + $0x18] sm:$0xff] }
 0x368   :  { %v488_v57 = vmax.f32 %v480_v56, 0.0  ;;  %v1033_v56 = vld [vmem:[%s2025_s13 + $0x10] sm:$0xff] }
 0x36a   :  { %1356 = vmatprep.mubr.f32.mxu1 %v488_v57  ;;  %v1032_v57 = vld [vmem:[%s2025_s13 + $0x8] sm:$0xff] }
 0x36b   :  { %1357 = vmatmul.mubr.f32.vlgmr.msra.gmra.mxu1 %v489_v58  ;;  %v1031_v58 = vld [vmem:[%s2025_s13] sm:$0xff] }
 0x36c   :  { %1363 = vmatprep.mubr.msk.f32.mxu1 %vm138_vm0, %v134_v59  ;;  %v1143_v59 = vld [vmem:[#allocation11] ss:$0 sm:$0xff] }
 0x42b   :  { %v1358_v10 = vpop.f32.mrf.mxu1 }
 0x42c   :  { %1359 = vmatprep.subr.mxu1 %v1358_v10 }
 0x42d   :  { %v572_v11 = vpop.f32.mrf.mxu1  ;;  %1360 = vmatpush3.msra.mxu1 %v1358_v10 }
 0x42e   :  { %1361 = vmatprep.subr.mxu1 %v572_v11 }
 0x42f   :  { %1362 = vmatpush3.msra.mxu1 %v572_v11 }
 0x430   :  { %1364 = vmatmul.mubr.msk.f32.vlgmr.msra.gmra.mxu1 %vm138_vm0, %v135_v12 }
 0x431   :  { %1405 = vmatprep.mubr.msk.f32.mxu1 %vm138_vm0, %v1751_v3 }
 0x4f0   :  { %v1365_v18 = vpop.f32.mrf.mxu1 }
 0x4f1   :  { %v666_v19 = vadd.f32 %v1365_v18, %v1140_v17 }
 0x4f2   :  { %v660_v20 = vpop.f32.mrf.mxu1 }
 0x4f3   :  { %v661_v21 = vadd.f32 %v1140_v17, %v660_v20  ;;  %v670_v23 = vmax.f32 %v666_v19, 0.0  ;;  %v1146_v17 = vld [vmem:[#allocation2] ss:$0 sm:$0xff] }
 0x4f5   :  { %v669_v22 = vmax.f32 %v661_v21, 0.0 }
 0x4f7   :  { %1398 = vmatprep.mubr.f32.mxu0 %v669_v22 }
 0x4f8   :  { %1399 = vmatmul.mubr.f32.vlgmr.msra.gmra.mxu0 %v670_v23 }
 0x4f9   :  { %1451 = vmatpush3.msra.mxu0 %v1046_v25  ;;  %1482 = vmatprep.mubr.msk.f32.mxu0 %vm1632_vm2, %v1631_v24 }
 0x4fa   :  { %1452 = vmatprep.subr.mxu0 %v1631_v24 }
 0x4fb   :  { %1453 = vmatpush3.msra.mxu0 %v1045_v26 }
 0x4fc   :  { %1454 = vmatprep.subr.mxu0 %v1631_v24 }
 0x4fd   :  { %1455 = vmatpush3.msra.mxu0 %v1044_v27 }
 0x4fe   :  { %1456 = vmatprep.subr.mxu0 %v1631_v24 }
 0x4ff   :  { %1457 = vmatpush3.msra.mxu0 %v1043_v28 }
 0x500   :  { %1458 = vmatprep.subr.mxu0 %v1631_v24 }
 0x501   :  { %1459 = vmatpush3.msra.mxu0 %v1042_v44 }
 0x502   :  { %1460 = vmatprep.subr.mxu0 %v1631_v24 }
 0x503   :  { %1461 = vmatpush3.msra.mxu0 %v1041_v46 }
 0x504   :  { %1462 = vmatprep.subr.mxu0 %v1631_v24 }
 0x505   :  { %1463 = vmatpush3.msra.mxu0 %v1040_v48 }
 0x506   :  { %1464 = vmatprep.subr.mxu0 %v1631_v24 }
 0x507   :  { %1465 = vmatpush3.msra.mxu0 %v1039_v50 }
 0x508   :  { %1466 = vmatprep.subr.mxu0 %v1631_v24 }
 0x509   :  { %1467 = vmatpush3.msra.mxu0 %v1038_v51 }
 0x50a   :  { %1468 = vmatprep.subr.mxu0 %v1631_v24 }
 0x50b   :  { %1469 = vmatpush3.msra.mxu0 %v1037_v52 }
 0x50c   :  { %1470 = vmatprep.subr.mxu0 %v1631_v24 }
 0x50d   :  { %1471 = vmatpush3.msra.mxu0 %v1036_v53 }
 0x50e   :  { %1472 = vmatprep.subr.mxu0 %v1631_v24 }
 0x50f   :  { %1473 = vmatpush3.msra.mxu0 %v1035_v54 }
 0x510   :  { %1474 = vmatprep.subr.mxu0 %v1631_v24 }
 0x511   :  { %1475 = vmatpush3.msra.mxu0 %v1034_v55 }
 0x512   :  { %1476 = vmatprep.subr.mxu0 %v1631_v24 }
 0x513   :  { %1477 = vmatpush3.msra.mxu0 %v1033_v56 }
 0x514   :  { %1478 = vmatprep.subr.mxu0 %v1631_v24 }
 0x515   :  { %1479 = vmatpush3.msra.mxu0 %v1032_v57 }
 0x516   :  { %1480 = vmatprep.subr.mxu0 %v1631_v24 }
 0x517   :  { %1481 = vmatpush3.msra.mxu0 %v1031_v58 }
 0x5b8   :  { %v1400_v29 = vpop.f32.mrf.mxu0 }
 0x5b9   :  { %1401 = vmatprep.subr.mxu1 %v1400_v29 }
 0x5ba   :  { %v753_v30 = vpop.f32.mrf.mxu0  ;;  %1402 = vmatpush3.msra.mxu1 %v1400_v29 }
 0x5bb   :  { %1403 = vmatprep.subr.mxu1 %v753_v30 }
 0x5bc   :  { %1404 = vmatpush3.msra.mxu1 %v753_v30 }
 0x5bd   :  { %1406 = vmatmul.mubr.msk.f32.vlgmr.msra.gmra.mxu1 %vm138_vm0, %v1755_v4  ;;  %1408 = vmatprep.subr.mxu1 %v861_v31 }
 0x5be   :  { %1409 = vmatpush3.msra.mxu1 %v861_v31 }
 0x5bf   :  { %1410 = vmatprep.subr.mxu1 %v860_v32 }
 0x5c0   :  { %1411 = vmatpush3.msra.mxu1 %v860_v32 }
 0x5c1   :  { %1412 = vmatprep.subr.mxu1 %v859_v33 }
 0x5c2   :  { %1413 = vmatpush3.msra.mxu1 %v859_v33 }
 0x5c3   :  { %1414 = vmatprep.subr.mxu1 %v858_v34 }
 0x5c4   :  { %1415 = vmatpush3.msra.mxu1 %v858_v34 }
 0x5c5   :  { %1416 = vmatprep.subr.mxu1 %v857_v35 }
 0x5c6   :  { %1417 = vmatpush3.msra.mxu1 %v857_v35 }
 0x5c7   :  { %1418 = vmatprep.subr.mxu1 %v856_v36 }
 0x5c8   :  { %1419 = vmatpush3.msra.mxu1 %v856_v36 }
 0x5c9   :  { %1420 = vmatprep.subr.mxu1 %v855_v37 }
 0x5ca   :  { %1421 = vmatpush3.msra.mxu1 %v855_v37 }
 0x5cb   :  { %1422 = vmatprep.subr.mxu1 %v854_v38 }
 0x5cc   :  { %1423 = vmatpush3.msra.mxu1 %v854_v38 }
 0x5cd   :  { %1424 = vmatprep.subr.mxu1 %v853_v39 }
 0x5ce   :  { %1425 = vmatpush3.msra.mxu1 %v853_v39 }
 0x5cf   :  { %1426 = vmatprep.subr.mxu1 %v852_v40 }
 0x5d0   :  { %1427 = vmatpush3.msra.mxu1 %v852_v40 }
 0x5d1   :  { %1428 = vmatprep.subr.mxu1 %v851_v41 }
 0x5d2   :  { %1429 = vmatpush3.msra.mxu1 %v851_v41 }
 0x5d3   :  { %1430 = vmatprep.subr.mxu1 %v850_v42 }
 0x5d4   :  { %1431 = vmatpush3.msra.mxu1 %v850_v42 }
 0x5d5   :  { %1432 = vmatprep.subr.mxu1 %v849_v43 }
 0x5d6   :  { %1433 = vmatpush3.msra.mxu1 %v849_v43 }
 0x5d7   :  { %1434 = vmatprep.subr.mxu1 %v848_v45 }
 0x5d8   :  { %1435 = vmatpush3.msra.mxu1 %v848_v45 }
 0x5d9   :  { %1436 = vmatprep.subr.mxu1 %v847_v47 }
 0x5da   :  { %1437 = vmatpush3.msra.mxu1 %v847_v47 }
 0x5db   :  { %1438 = vmatprep.subr.mxu1 %v846_v49 }
 0x5dc   :  { %1439 = vmatpush3.msra.mxu1 %v846_v49 }
 0x67d   :  { %v1407_v60 = vpop.f32.mrf.mxu1 }
 0x67e   :  { %v841_v61 = vadd.f32 %v1407_v60, %v1143_v59 }
 0x67f   :  { %v835_v62 = vpop.f32.mrf.mxu1 }
 0x680   :  { %v836_v63 = vadd.f32 %v1143_v59, %v835_v62  ;;  %v845_v0 = vmax.f32 %v841_v61, 0.0 }
 0x682   :  { %v844_v1 = vmax.f32 %v836_v63, 0.0 }
 0x684   :  { %v1022_v2 = vadd.f32 %v845_v0, %v844_v1  ;;  %1440 = vmatprep.mubr.f32.mxu1 %v844_v1 }
 0x685   :  { %1441 = vmatmul.mubr.f32.vlgmr.msra.gmra.mxu1 %v845_v0 }
 0x686   :  { %v1023_v5 = vrot.slane %v1022_v2, 4  ;;  %1447 = vmatprep.mubr.msk.f32.mxu1 %vm138_vm0, %v1751_v3  ;;  %v1047_v3 = vld [vmem:[%s2026_s14] sm:$0x1] }
 0x688   :  { %v1024_v6 = vadd.f32 %v1023_v5, %v1022_v2 }
 0x68a   :  { %v1025_v7 = vrot.slane %v1024_v6, 2 }
 0x68c   :  { %v1026_v8 = vadd.f32 %v1025_v7, %v1024_v6 }
 0x68e   :  { %v1027_v9 = vrot.slane %v1026_v8, 1 }
 0x690   :  { %v1028_v10 = vadd.f32 %v1027_v9, %v1026_v8 }
 0x692   :  { %v1030_v11 = vmul.f32 0.0625, %v1028_v10 }
 0x694   :  { %1483 = vmatmul.mubr.f32.vlgmr.msra.gmra.mxu0 %v1030_v11 }
 0x745   :  { %v1442_v12 = vpop.f32.mrf.mxu1 }
 0x746   :  { %1443 = vmatprep.subr.mxu1 %v1442_v12 }
 0x747   :  { %v928_v13 = vpop.f32.mrf.mxu1  ;;  %1444 = vmatpush3.msra.mxu1 %v1442_v12 }
 0x748   :  { %1445 = vmatprep.subr.mxu1 %v928_v13 }
 0x749   :  { %1446 = vmatpush3.msra.mxu1 %v928_v13 }
 0x74a   :  { %1448 = vmatmul.mubr.msk.f32.vlgmr.msra.gmra.mxu1 %vm138_vm0, %v1755_v4 }
 0x754   :  { %v1114_v14 = vpop.f32.mrf.mxu0 }
 0x755   :  { %v1115_v15 = vadd.f32 %v1114_v14, %v1047_v3 }
 0x756   :  { %v1484_v16 = vpop.f32.mrf.mxu0 }
 0x757   :  { %1119 = vst.msk [vmem:[%s2028_s16] sm:$0x1] %vm1118_vm3, %v1115_v15 }
 0x80a   :  { %v1449_v18 = vpop.f32.mrf.mxu1 }
 0x80b   :  { %v1016_v19 = vadd.f32 %v1449_v18, %v1146_v17 }
 0x80c   :  { %v1010_v20 = vpop.f32.mrf.mxu1 }
 0x80d   :  { %1021 = vst.msk [vmem:[%s2027_s15 + $0x8] sm:$0xff] %vm1019_vm4, %v1016_v19  ;;  %v1011_v4 = vadd.f32 %v1146_v17, %v1010_v20 }
 0x80f   :  { %1020 = vst.msk [vmem:[%s2027_s15] sm:$0xff] %vm1019_vm4, %v1011_v4 }
 0x810   :  { %1128 = vsyncpa [#allocation4], 1 }
 0x811   :  { %1129 = vsyncpa [#allocation6], 1 }
 0x812   :  { %1130 = vsyncpa [#allocation9], 1 }
 0x813   :  { %1131 = vsyncpa [#allocation12], 1 }

</bundles_post_ra>
